<compile_context>
chip_gen: v5e
topology: v5e:2x2
jax: 0.10.0
libtpu: 0.0.40
codegen_flags: <defaults>
</compile_context>

<pallas_src>
import jax
import jax.numpy as jnp
from jax.experimental import pallas as pl
from jax.experimental.pallas import tpu as pltpu


def _round_up(n, m):
    return ((n + m - 1) // m) * m


def _cdiv(a, b):
    return -(-a // b)


def _num_tensorcores():
    """Best-effort TensorCore count of the local device (defensive: 1 if unknown)."""
    try:
        return max(1, int(getattr(jax.devices()[0], "num_cores", 1)))
    except Exception:  # pragma: no cover - defensive
        return 1


def _max_tile_rows(feature_dim, vmem_budget_bytes):
    """Largest batch-tile (rows) whose VMEM footprint fits the budget.

    Per-row bytes (lane dim padded to 128):
      * double-buffered f32 x block        : 2 * pad128(F) * 4
      * f32 h1 (64 -> 128 lanes) + bf16 copy
      * f32 h2 (16 -> 128 lanes) + bf16 copy
      * (8, tb) transposed layer-3 result + double-buffered (1, tb) out block
    """
    f_pad = _round_up(max(int(feature_dim), 1), 128)
    per_row = (
        2 * f_pad * 4       # x (double-buffered, f32)
        + 128 * 4 + 128 * 2  # h1 f32 + bf16 copy
        + 128 * 4 + 128 * 2  # h2 f32 + bf16 copy
        + 8 * 4              # (8, tb) layer-3 accumulator
        + 2 * 8 * 4          # out block, double-buffered
    )
    rows = (vmem_budget_bytes // per_row) // 16 * 16
    return int(min(max(rows, 16), 16384))


def discriminator_kernel(x_ref, w1_ref, b1_ref, w2_ref, b2_ref, w3_ref, b3_ref,
                         out_ref):
    # Cast on-vreg (idle VALU slots) instead of a separate XLA cast pass in HBM.
    x = x_ref[...].astype(jnp.bfloat16)                              # (TB, F)

    # Layer 1: bf16 MXU matmul, f32 accumulate + f32 epilogue (v5e-safe).
    h1 = jnp.dot(x, w1_ref[...], preferred_element_type=jnp.float32)    # (TB, 64)
    h1 = h1 + b1_ref[...]
    h1 = jnp.maximum(h1, 0.2 * h1)                                   # LeakyReLU(0.2)

    # Layer 2.
    h2 = jnp.dot(h1.astype(jnp.bfloat16), w2_ref[...],
                 preferred_element_type=jnp.float32)                 # (TB, 16)
    h2 = h2 + b2_ref[...]
    h2 = jnp.maximum(h2, 0.2 * h2)

    # Layer 3, computed transposed/lane-dense: w3 is stored (8, 16) bf16 with
    # the real weights in row 0 and zero rows below.  Result maps batch onto
    # lanes, so the store is an unmasked full-width vst.
    h3 = jax.lax.dot_general(w3_ref[...], h2.astype(jnp.bfloat16),
                             (((1,), (1,)), ((), ())),
                             preferred_element_type=jnp.float32)     # (8, TB)
    h3 = h3[0:1, :] + b3_ref[...]                                    # (1, TB)

    # Sigmoid: exp and approx reciprocal both run on the (otherwise idle) EUP.
    sig = pl.reciprocal(1.0 + jnp.exp(-h3), approx=True)             # (1, TB)
    out_ref[...] = sig.reshape(out_ref.shape)


def prepare_params(params, *, h1_pad=64):
    """One-time prep: pad hidden width 62 -> 64 with zeros (w2 gets matching
    zero rows, so results are unchanged), cast matmul weights to bf16, and
    store the final layer in (out, in) layout padded to 8 rows for the
    lane-dense transposed dot.  Reuse the result across forward calls."""
    _, h1 = params["w1"].shape
    pad = h1_pad - h1
    return {
        "w1": jnp.pad(params["w1"], ((0, 0), (0, pad))).astype(jnp.bfloat16),
        "b1": jnp.pad(params["b1"], ((0, 0), (0, pad))).astype(jnp.float32),
        "w2": jnp.pad(params["w2"], ((0, pad), (0, 0))).astype(jnp.bfloat16),
        "b2": params["b2"].astype(jnp.float32),
        "w3": jnp.pad(params["w3"].T, ((0, 7), (0, 0))).astype(jnp.bfloat16),  # (8, 16)
        "b3": params["b3"].reshape(1, 1).astype(jnp.float32),
    }


def discriminator_forward(x, kparams, *, tile_rows=None,
                          vmem_budget_bytes=20 << 20):
    """x: (B, F) float (f32 expected; DMA'd as-is).  kparams: prepare_params()."""
    B, F = x.shape
    H1 = kparams["w1"].shape[1]
    H2 = kparams["w2"].shape[1]

    if tile_rows is None:
        tb_max = _max_tile_rows(F, vmem_budget_bytes)
        n_cores = _num_tensorcores()
        # Only split the batch for multi-TensorCore chips (e.g. v7x), and only
        # when the batch is large enough to amortize the extra grid step.
        min_tiles = n_cores if (n_cores > 1 and B >= n_cores * 1024) else 1
        n_tiles = max(_cdiv(B, tb_max), min_tiles)
        tb = _round_up(_cdiv(B, n_tiles), 16)
    else:
        tb = _round_up(max(int(tile_rows), 16), 16)
    n_tiles = _cdiv(B, tb)   # ragged tail handled by Pallas partial last block

    full = lambda shape: pl.BlockSpec(shape, lambda i: (0, 0))

    out = pl.pallas_call(
        discriminator_kernel,
        out_shape=jax.ShapeDtypeStruct((n_tiles, 1, tb), jnp.float32),
        grid_spec=pltpu.PrefetchScalarGridSpec(
            num_scalar_prefetch=0,
            grid=(n_tiles,),
            in_specs=[
                pl.BlockSpec((tb, F), lambda i: (i, 0)),   # x: batch tile
                full((F, H1)), full((1, H1)),              # layer 1
                full((H1, H2)), full((1, H2)),             # layer 2
                full((8, H2)), full((1, 1)),               # layer 3 (out, in)
            ],
            out_specs=pl.BlockSpec((1, 1, tb), lambda i: (i, 0, 0)),
        ),
        compiler_params=pltpu.CompilerParams(
            dimension_semantics=("parallel",),
            vmem_limit_bytes=32 << 20),
    )(x, kparams["w1"], kparams["b1"], kparams["w2"], kparams["b2"],
      kparams["w3"], kparams["b3"])

    # Lane-dense (n_tiles, 1, tb) slab -> (B, 1) column; drop padded rows
    # (they hold unspecified values from the partial last block).
    return out.reshape(n_tiles * tb, 1)[:B]


def init_params(key, feature_shape):
    """Deterministic init mimicking nn.Linear default U(-1/sqrt(fan_in), +).
    Logical layout: w is (in, out), b is (1, out)."""
    dims = [(feature_shape, 62), (62, 16), (16, 1)]
    params = {}
    for idx, (fan_in, fan_out) in enumerate(dims, start=1):
        key, kw, kb = jax.random.split(key, 3)
        bound = 1.0 / (fan_in ** 0.5)
        params[f"w{idx}"] = jax.random.uniform(
            kw, (fan_in, fan_out), jnp.float32, -bound, bound)
        params[f"b{idx}"] = jax.random.uniform(
            kb, (1, fan_out), jnp.float32, -bound, bound)
    return params


def reference_forward(x, p):
    h1 = x @ p["w1"] + p["b1"]
    h1 = jnp.where(h1 > 0, h1, 0.2 * h1)
    h2 = h1 @ p["w2"] + p["b2"]
    h2 = jnp.where(h2 > 0, h2, 0.2 * h2)
    h3 = h2 @ p["w3"] + p["b3"]
    return jax.nn.sigmoid(h3)


if __name__ == "__main__":
    FEATURE_SHAPE = 32   # stands in for opt.vector_size
    BATCH = 8

    key = jax.random.PRNGKey(0)
    key, kx, kx2 = jax.random.split(key, 3)
    params = init_params(key, FEATURE_SHAPE)

    # Snap the matmul operands to bf16-representable values so the f32
    # reference and the bf16-fed kernel compute the same function; remaining
    # deltas are only accumulation order / intermediate rounding and the
    # approx reciprocal in the sigmoid.
    for k in ("w1", "w2", "w3"):
        params[k] = params[k].astype(jnp.bfloat16).astype(jnp.float32)
    kparams = prepare_params(params)

    # Case 1: tiny batch, single tile with a partial (OOB-tail) x block.
    x = jax.random.normal(kx, (BATCH, FEATURE_SHAPE), jnp.float32)
    x = x.astype(jnp.bfloat16).astype(jnp.float32)
    out = jax.block_until_ready(discriminator_forward(x, kparams))
    ref = reference_forward(x, params)
    assert out.shape == (BATCH, 1)
    assert jnp.allclose(out, ref, atol=7e-3, rtol=7e-3), "mismatch vs reference"

    # Case 2: force multiple grid steps + ragged tail to exercise the grid path.
    B2 = 40
    x2 = jax.random.normal(kx2, (B2, FEATURE_SHAPE), jnp.float32)
    x2 = x2.astype(jnp.bfloat16).astype(jnp.float32)
    out2 = jax.block_until_ready(discriminator_forward(x2, kparams, tile_rows=16))
    ref2 = reference_forward(x2, params)
    assert out2.shape == (B2, 1)
    assert jnp.allclose(out2, ref2, atol=7e-3, rtol=7e-3), "mismatch vs reference (tiled)"

    print("KERNEL_OK")
</pallas_src>

<mosaic_0001>
module attributes {stable_mosaic.version = 11 : i64} {
  func.func @discriminator_kernel(%arg0: i32, %arg1: memref<16x32xf32, #tpu.memory_space<vmem>>, %arg2: memref<32x64xbf16, #tpu.memory_space<vmem>>, %arg3: memref<1x64xf32, #tpu.memory_space<vmem>>, %arg4: memref<64x16xbf16, #tpu.memory_space<vmem>>, %arg5: memref<1x16xf32, #tpu.memory_space<vmem>>, %arg6: memref<8x16xbf16, #tpu.memory_space<vmem>>, %arg7: memref<1x1xf32, #tpu.memory_space<vmem>>, %arg8: memref<1x1x16xf32, #tpu.memory_space<vmem>>) attributes {dimension_semantics = [#tpu.dimension_semantics<parallel>], iteration_bounds = array<i64: 1>, scalar_prefetch = 0 : i64, scratch_operands = 0 : i64, tpu.core_type = #tpu.core_type<tc>, window_params = [{transform_indices = @transform_0, window_bounds = array<i64: 16, 32>}, {pipeline_mode = #tpu.pipeline_mode<synchronous>, transform_indices = @transform_1, window_bounds = array<i64: 32, 64>}, {pipeline_mode = #tpu.pipeline_mode<synchronous>, transform_indices = @transform_2, window_bounds = array<i64: 1, 64>}, {pipeline_mode = #tpu.pipeline_mode<synchronous>, transform_indices = @transform_3, window_bounds = array<i64: 64, 16>}, {pipeline_mode = #tpu.pipeline_mode<synchronous>, transform_indices = @transform_4, window_bounds = array<i64: 1, 16>}, {pipeline_mode = #tpu.pipeline_mode<synchronous>, transform_indices = @transform_5, window_bounds = array<i64: 8, 16>}, {pipeline_mode = #tpu.pipeline_mode<synchronous>, transform_indices = @transform_6, window_bounds = array<i64: 1, 1>}, {transform_indices = @transform_7, window_bounds = array<i64: 1, 1, 16>}]} {
    %c0 = arith.constant 0 : index
    %c0_0 = arith.constant 0 : index
    %0 = vector.load %arg1[%c0, %c0_0] : memref<16x32xf32, #tpu.memory_space<vmem>>, vector<16x32xf32>
    %1 = arith.truncf %0 : vector<16x32xf32> to vector<16x32xbf16>
    %c0_1 = arith.constant 0 : index
    %c0_2 = arith.constant 0 : index
    %2 = vector.load %arg2[%c0_1, %c0_2] : memref<32x64xbf16, #tpu.memory_space<vmem>>, vector<32x64xbf16>
    %cst = arith.constant dense<0.000000e+00> : vector<16x64xf32>
    %3 = tpu.matmul %1, %2, %cst {dimension_numbers = #tpu.dot_dimension_numbers<[1], [0], [0], [1], [0, 0, 1, 1], [], []>} : vector<16x32xbf16>, vector<32x64xbf16>, vector<16x64xf32> -> vector<16x64xf32>
    %c0_3 = arith.constant 0 : index
    %c0_4 = arith.constant 0 : index
    %4 = vector.load %arg3[%c0_3, %c0_4] : memref<1x64xf32, #tpu.memory_space<vmem>>, vector<1x64xf32>
    %5 = vector.broadcast %4 : vector<1x64xf32> to vector<16x64xf32>
    %6 = arith.addf %3, %5 : vector<16x64xf32>
    %cst_5 = arith.constant 2.000000e-01 : f32
    %7 = vector.broadcast %cst_5 : f32 to vector<16x64xf32>
    %8 = arith.mulf %7, %6 : vector<16x64xf32>
    %9 = arith.maximumf %6, %8 : vector<16x64xf32>
    %10 = arith.truncf %9 : vector<16x64xf32> to vector<16x64xbf16>
    %c0_6 = arith.constant 0 : index
    %c0_7 = arith.constant 0 : index
    %11 = vector.load %arg4[%c0_6, %c0_7] : memref<64x16xbf16, #tpu.memory_space<vmem>>, vector<64x16xbf16>
    %cst_8 = arith.constant dense<0.000000e+00> : vector<16x16xf32>
    %12 = tpu.matmul %10, %11, %cst_8 {dimension_numbers = #tpu.dot_dimension_numbers<[1], [0], [0], [1], [0, 0, 1, 1], [], []>} : vector<16x64xbf16>, vector<64x16xbf16>, vector<16x16xf32> -> vector<16x16xf32>
    %c0_9 = arith.constant 0 : index
    %c0_10 = arith.constant 0 : index
    %13 = vector.load %arg5[%c0_9, %c0_10] : memref<1x16xf32, #tpu.memory_space<vmem>>, vector<1x16xf32>
    %14 = vector.broadcast %13 : vector<1x16xf32> to vector<16x16xf32>
    %15 = arith.addf %12, %14 : vector<16x16xf32>
    %cst_11 = arith.constant 2.000000e-01 : f32
    %16 = vector.broadcast %cst_11 : f32 to vector<16x16xf32>
    %17 = arith.mulf %16, %15 : vector<16x16xf32>
    %18 = arith.maximumf %15, %17 : vector<16x16xf32>
    %c0_12 = arith.constant 0 : index
    %c0_13 = arith.constant 0 : index
    %19 = vector.load %arg6[%c0_12, %c0_13] : memref<8x16xbf16, #tpu.memory_space<vmem>>, vector<8x16xbf16>
    %20 = arith.truncf %18 : vector<16x16xf32> to vector<16x16xbf16>
    %cst_14 = arith.constant dense<0.000000e+00> : vector<8x16xf32>
    %21 = tpu.matmul %19, %20, %cst_14 {dimension_numbers = #tpu.dot_dimension_numbers<[1], [1], [0], [0], [0, 0, 1, 0], [], []>} : vector<8x16xbf16>, vector<16x16xbf16>, vector<8x16xf32> -> vector<8x16xf32>
    %22 = vector.extract_strided_slice %21 {offsets = [0, 0], sizes = [1, 16], strides = [1, 1]} : vector<8x16xf32> to vector<1x16xf32>
    %c0_15 = arith.constant 0 : index
    %c0_16 = arith.constant 0 : index
    %23 = vector.load %arg7[%c0_15, %c0_16] : memref<1x1xf32, #tpu.memory_space<vmem>>, vector<1x1xf32>
    %24 = vector.broadcast %23 : vector<1x1xf32> to vector<1x16xf32>
    %25 = arith.addf %22, %24 : vector<1x16xf32>
    %cst_17 = arith.constant 0.000000e+00 : f32
    %26 = vector.broadcast %cst_17 : f32 to vector<1x16xf32>
    %27 = arith.subf %26, %25 : vector<1x16xf32>
    %28 = math.exp %27 : vector<1x16xf32>
    %cst_18 = arith.constant 1.000000e+00 : f32
    %29 = vector.broadcast %cst_18 : f32 to vector<1x16xf32>
    %30 = arith.addf %29, %28 : vector<1x16xf32>
    %31 = tpu.reciprocal %30 {approx = true} : vector<1x16xf32> -> vector<1x16xf32>
    %32 = vector.shape_cast %31 : vector<1x16xf32> to vector<1x1x16xf32>
    %c0_19 = arith.constant 0 : index
    %c0_20 = arith.constant 0 : index
    %c0_21 = arith.constant 0 : index
    %33 = vector.load %arg8[%c0_19, %c0_20, %c0_21] : memref<1x1x16xf32, #tpu.memory_space<vmem>>, vector<1x1x16xf32>
    tpu.vector_store %arg8[%c0_19, %c0_20, %c0_21], %32 {strides = array<i32>} : memref<1x1x16xf32, #tpu.memory_space<vmem>>, vector<1x1x16xf32>,
    return
  }
  func.func @transform_0(%arg0: i32) -> (i32, i32) {
    %c0_i32 = arith.constant 0 : i32
    %c0_i32_0 = arith.constant 0 : i32
    return %arg0, %c0_i32 : i32, i32
  }
  func.func @transform_1(%arg0: i32) -> (i32, i32) {
    %c0_i32 = arith.constant 0 : i32
    %c0_i32_0 = arith.constant 0 : i32
    %c0_i32_1 = arith.constant 0 : i32
    return %c0_i32, %c0_i32_0 : i32, i32
  }
  func.func @transform_2(%arg0: i32) -> (i32, i32) {
    %c0_i32 = arith.constant 0 : i32
    %c0_i32_0 = arith.constant 0 : i32
    %c0_i32_1 = arith.constant 0 : i32
    return %c0_i32, %c0_i32_0 : i32, i32
  }
  func.func @transform_3(%arg0: i32) -> (i32, i32) {
    %c0_i32 = arith.constant 0 : i32
    %c0_i32_0 = arith.constant 0 : i32
    %c0_i32_1 = arith.constant 0 : i32
    return %c0_i32, %c0_i32_0 : i32, i32
  }
  func.func @transform_4(%arg0: i32) -> (i32, i32) {
    %c0_i32 = arith.constant 0 : i32
    %c0_i32_0 = arith.constant 0 : i32
    %c0_i32_1 = arith.constant 0 : i32
    return %c0_i32, %c0_i32_0 : i32, i32
  }
  func.func @transform_5(%arg0: i32) -> (i32, i32) {
    %c0_i32 = arith.constant 0 : i32
    %c0_i32_0 = arith.constant 0 : i32
    %c0_i32_1 = arith.constant 0 : i32
    return %c0_i32, %c0_i32_0 : i32, i32
  }
  func.func @transform_6(%arg0: i32) -> (i32, i32) {
    %c0_i32 = arith.constant 0 : i32
    %c0_i32_0 = arith.constant 0 : i32
    %c0_i32_1 = arith.constant 0 : i32
    return %c0_i32, %c0_i32_0 : i32, i32
  }
  func.func @transform_7(%arg0: i32) -> (i32, i32, i32) {
    %c0_i32 = arith.constant 0 : i32
    %c0_i32_0 = arith.constant 0 : i32
    %c0_i32_1 = arith.constant 0 : i32
    return %arg0, %c0_i32, %c0_i32_0 : i32, i32, i32
  }
}

</mosaic_0001>

<bundles_post_ra>
// kernel: tpu_custom_call.1
= control target key start
LH: loop header
LB: loop body
LE: loop exit
PB: predicated region body
PF: predicated region fallthrough
CT: control target
= control target key end

     0   :  { %s336_s0 = inlined_call_operand.vmem [shape: f32[8,32], index: 0, kind: input, shape index: {}]   ;;  %s337_s1 = inlined_call_operand.vmem [shape: bf16[32,64], index: 1, kind: input, shape index: {}]   ;;  %s338_s2 = inlined_call_operand.vmem [shape: f32[1,64], index: 2, kind: input, shape index: {}]   ;;  %s339_s3 = inlined_call_operand.vmem [shape: bf16[64,16], index: 3, kind: input, shape index: {}]   ;;  %s340_s4 = inlined_call_operand.vmem [shape: f32[1,16], index: 4, kind: input, shape index: {}]   ;;  %s341_s5 = inlined_call_operand.vmem [shape: bf16[8,16], index: 5, kind: input, shape index: {}]   ;;  %s342_s6 = inlined_call_operand.<no memory space> [shape: f32[1,1], index: 6, kind: input, shape index: {}]   ;;  %s343_s7 = inlined_call_operand.hbm [shape: f32[1,1,16], index: 7, kind: output, shape index: {}]  }
   0x1   :  { %v12_v0 = vstv %s342_s6 }
   0x2   :  { %13 = vst [vmem:[#allocation2] sm:$0x1] %v12_v0 }
   0x3   :  { %v215_v1 = vld [vmem:[%s337_s1 + $0x8] sm:$0xff]  ;;  %v214_v2 = vld [vmem:[%s337_s1] sm:$0xff] }
   0x4   :  { %v30_v3 = vld [vmem:[%s336_s0] sm:$0xff]  ;;  %63 = vmatpush.bf16.msra.mxu0 %v215_v1  ;;  %v31_v4 = vld [vmem:[%s336_s0 + $0x8] sm:$0xff] }
   0x5   :  { %14 = vsyncpa [#allocation4], 0  ;;  %v32_v5 = vpack.c.bf16 %v31_v4, %v30_v3  ;;  %vm53_vm0 = vcmask 261120   ;;  %v219_v6 = vld [vmem:[%s339_s3 + $0x18] sm:$0xff]  ;;  %v218_v7 = vld [vmem:[%s339_s3 + $0x10] sm:$0xff]  ;;  %vm112_vm1 = vcmask 523264  }
   0x6   :  { %120 = vmatpush.bf16.msra.mxu1 %v219_v6  ;;  %v217_v8 = vld [vmem:[%s339_s3 + $0x8] sm:$0xff]  ;;  %v216_v9 = vld [vmem:[%s339_s3] sm:$0xff]  ;;  %v255_v21 = vmov 0   ;;  %vm136_vm2 = vcmask 130048   ;;  %s178_s23 = sshll.u32 %s343_s7, 4  ;;  %vm169_vm3 = vcmask 122880   ;;  %s179_s23 = int_to_ptr.hbm [resolvable:$true] %s178_s23 }
   0x7   :  { %v223_v11 = vld [vmem:[%s338_s2] ss:$0 sm:$0xff]  ;;  %222 = vset.pattern.permute.xlu0 %v255_v21 }
   0x8   :  { %64 = vmatpush.bf16.msra.mxu0 %v214_v2  ;;  %v224_v23 = vld [vmem:[%s340_s4] ss:$0 sm:$0xff]  ;;  %s256_s4 = smov [#allocation3]  }
   0x9   :  { %v156_v20 = vld [vmem:[#allocation2] sm:$0x1]  ;;  %s176_s20 = sshll.u32 %s256_s4, 4  ;;  %s177_s20 = int_to_ptr.vmem [resolvable:$true] %s176_s20 }
   0xa   :  { %121 = vmatpush.bf16.msra.mxu1 %v218_v7  ;;  %159 = vperm.xlu0 %222, %v156_v20   ;;  %v134_v33 = vld [vmem:[%s341_s5] sm:$0xf] }
   0xb   :  { %195 = vmatmul.msk.bf16.vlgmr.msra.gmra.mxu0 %vm53_vm0, %v32_v5 }
   0xe   :  { %122 = vmatpush.bf16.msra.mxu1 %v217_v8 }
  0x12   :  { %123 = vmatpush.bf16.msra.mxu1 %v216_v9 }
  0x7c   :  { %v160_v34 = vpop.permute.xlu0 %159 }
  0x7d   :  { %v162_v35 = vperm.slane %v160_v34, 0 }
  0x88   :  { %v66_v10 = vpop.f32.mrf.mxu0 }
  0x89   :  { %v67_v12 = vadd.f32 %v223_v11, %v66_v10 }
  0x8b   :  { %v71_v14 = vmul.f32 0.2, %v67_v12 }
  0x8d   :  { %v73_v17 = vmax.f32 %v67_v12, %v71_v14 }
  0x90   :  { %v68_v13 = vpop.f32.mrf.mxu0 }
  0x91   :  { %v69_v15 = vadd.f32 %v223_v11, %v68_v13 }
  0x93   :  { %v72_v16 = vmul.f32 0.2, %v69_v15 }
  0x95   :  { %v74_v18 = vmax.f32 %v69_v15, %v72_v16 }
  0x97   :  { %v75_v19 = vpack.c.bf16 %v74_v18, %v73_v17 }
  0x99   :  { %212 = vmatmul.msk.bf16.vlgmr.msra.gmra.mxu1 %vm112_vm1, %v75_v19 }
 0x116   :  { %v125_v22 = vpop.f32.mrf.mxu1 }
 0x117   :  { %v126_v24 = vadd.f32 %v224_v23, %v125_v22 }
 0x119   :  { %v130_v26 = vmul.f32 0.2, %v126_v24 }
 0x11b   :  { %v132_v29 = vmax.f32 %v126_v24, %v130_v26 }
 0x11e   :  { %v127_v25 = vpop.f32.mrf.mxu1 }
 0x11f   :  { %v128_v27 = vadd.f32 %v224_v23, %v127_v25 }
 0x121   :  { %v131_v28 = vmul.f32 0.2, %v128_v27 }
 0x123   :  { %v133_v30 = vmax.f32 %v128_v27, %v131_v28 }
 0x125   :  { %v135_v31 = vpack.c.bf16 %v133_v30, %v132_v29 }
 0x127   :  { %v141_v32 = vsel %vm136_vm2, %v135_v31, 0 }
 0x128   :  { %150 = vmatpush.bf16.xpose.msra.mxu2 %v141_v32 }
 0x12f   :  { %213 = vmatmul.msk.bf16.vlgmr.msra.gmra.mxu2 %vm136_vm2, %v134_v33 }
 0x1b2   :  { %v152_v36 = vpop.f32.mrf.mxu2 }
 0x1b3   :  { %v163_v37 = vadd.f32 %v162_v35, %v152_v36 }
 0x1b5   :  { %v164_v38 = vsub.f32 0.0, %v163_v37 }
 0x1b7   :  { %v165_v39 = vmul.f32 1.442695, %v164_v38 }
 0x1b9   :  { %225 = vpow2.f32 %v165_v39 }
 0x1ba   :  { %v154_v40 = vpop.f32.mrf.mxu2 }
 0x1bf   :  { %v226_v41 = vpop.eup %225 }
 0x1c0   :  { %v167_v42 = vadd.f32 1.0, %v226_v41 }
 0x1c2   :  { %227 = vrcp.f32 %v167_v42 }
 0x1c8   :  { %v228_v43 = vpop.eup %227 }
 0x1c9   :  { %170 = vst.msk [vmem:[#allocation3] sm:$0x1] %vm169_vm3, %v228_v43 }
 0x1ca   :  { %181 = dma.vmem_to_hbm [thread:$0]  %s177_s20, 16, %s179_s23, [#allocation4]  }
 0x1cb   :  { %253 = dma.done.wait [#allocation4], 16  }
 0x1cc   :  { %254 = vsyncadd [#allocation4], 4294967280 }
 0x1cd   :  { %186 = vsyncpa [#allocation4], 1 }

</bundles_post_ra>
